<compile_context>
chip_gen: v6e
topology: v6e:2x2x1
jax: 0.10.0
libtpu: 0.0.40
codegen_flags: <defaults>
</compile_context>

<pallas_src>
import functools

import jax
import jax.numpy as jnp
from jax.experimental import pallas as pl
from jax.experimental.pallas import tpu as pltpu

LANE = 128
GRID_THRESHOLD = 256     # switch to the gridded (>=2 step) path from here
MAX_BATCH_TILE = 2048    # keeps the per-step working set (~5 MiB at 2048)
                         # under v5e's 16 MiB scoped-VMEM default and well
                         # inside v7x's 64 MiB physical VMEM.


def _round_up(n, m):
    return ((n + m - 1) // m) * m


def _pad_axis(a, axis, target):
    pad = target - a.shape[axis]
    if pad <= 0:
        return a
    widths = [(0, 0)] * a.ndim
    widths[axis] = (0, pad)
    return jnp.pad(a, widths)


def _default_bf16_epilogue():
    """bf16 bias/ReLU epilogue only where the VPU has bf16 VALUs (v6e/v7x)."""
    try:
        kind = jax.devices()[0].device_kind.lower()
    except Exception:
        return False
    for old in ("v2", "v3", "v4", "v5"):
        if old in kind:
            return False
    return True


_BF16_EPILOGUE = _default_bf16_epilogue()


# ----------------------------------------------------------------------------
# Kernel
# ----------------------------------------------------------------------------
def mlp_kernel(x_ref, w1_ref, b1_ref, w2_ref, b2_ref, o_ref, *, bf16_epilogue):
    # Layer 1: bf16 MXU matmul, f32 accumulation.  x arrives f32 with its real
    # (un-padded) contraction dim; the bf16 cast happens in-register.
    x = x_ref[...].astype(jnp.bfloat16)
    h = jnp.dot(x, w1_ref[...], preferred_element_type=jnp.float32)
    if bf16_epilogue:
        # v6e/v7x: bf16 VALU -> bias-add + ReLU on the narrow type.
        h = jnp.maximum(h.astype(jnp.bfloat16) + b1_ref[...].astype(jnp.bfloat16),
                        0.0)
    else:
        # v5e: no bf16 VALU -> keep the epilogue in f32, single cast for MXU.
        h = jnp.maximum(h + b1_ref[...], 0.0).astype(jnp.bfloat16)
    # Layer 2: lane-dense (A padded to 128) output columns, f32 accumulation.
    q = jnp.dot(h, w2_ref[...], preferred_element_type=jnp.float32)
    # bf16 store: halves the dominant HBM writeback stream; wrapper upcasts.
    o_ref[...] = (q + b2_ref[...]).astype(o_ref.dtype)


# ----------------------------------------------------------------------------
# One-time parameter preparation (hoisted out of the per-call path)
# ----------------------------------------------------------------------------
def prepare_params(w1, b1, w2, b2):
    """Pad num_actions to a lane-dense 128 and cast MXU operands to bf16.

    Call once at init / target-network sync, NOT per forward call.
    w1: (D_in, 256); b1: (256,) or (1, 256); w2: (256, A); b2: (A,) or (1, A).
    """
    d_in, hidden = w1.shape
    num_actions = w2.shape[1]
    a_pad = _round_up(max(num_actions, 1), LANE)

    w1p = jnp.asarray(w1).astype(jnp.bfloat16)                       # (D_in, H)
    b1p = jnp.asarray(b1, jnp.float32).reshape(1, hidden)            # (1, H)
    w2p = _pad_axis(jnp.asarray(w2), 1, a_pad).astype(jnp.bfloat16)  # (H, A_pad)
    b2p = _pad_axis(jnp.asarray(b2, jnp.float32).reshape(1, num_actions),
                    1, a_pad)                                        # (1, A_pad)
    return (w1p, b1p, w2p, b2p, num_actions)


# ----------------------------------------------------------------------------
# Forward wrapper
# ----------------------------------------------------------------------------
def q_network_forward(x, prepared, *, max_batch_tile=MAX_BATCH_TILE,
                      grid_threshold=GRID_THRESHOLD):
    """x: (B, D_in) f32.  prepared: output of prepare_params.  Returns (B, A) f32."""
    w1p, b1p, w2p, b2p, num_actions = prepared
    B, d_in = x.shape
    hidden = w1p.shape[1]
    a_pad = w2p.shape[1]
    assert w1p.shape[0] == d_in, "input dim mismatch with prepared params"

    kernel = functools.partial(mlp_kernel, bf16_epilogue=_BF16_EPILOGUE)

    if B < grid_threshold:
        # Acting path: whole working set is one VMEM-resident block, no grid,
        # no pipelining, no wrapper-side padding of x.
        out = pl.pallas_call(
            kernel,
            out_shape=jax.ShapeDtypeStruct((B, a_pad), jnp.bfloat16),
            in_specs=[pl.BlockSpec(memory_space=pltpu.MemorySpace.VMEM)] * 5,
            out_specs=pl.BlockSpec(memory_space=pltpu.MemorySpace.VMEM),
        )(x, w1p, b1p, w2p, b2p)
    else:
        # Training / replay path: tile only the batch axis.  At least 2 grid
        # steps so v7x's two TensorCores both get work; tile rounded to the
        # sublane (8) so batch padding waste is a few rows, not a whole tile.
        n_steps = max(2, pl.cdiv(B, max_batch_tile))
        tile = max(8, min(max_batch_tile, _round_up(pl.cdiv(B, n_steps), 8)))
        n_steps = pl.cdiv(B, tile)
        b_padded = n_steps * tile
        xp = x if b_padded == B else jnp.pad(x, ((0, b_padded - B), (0, 0)))

        flops = 2 * b_padded * (d_in * hidden + hidden * a_pad)
        bytes_accessed = (b_padded * d_in * 4            # x (f32 read)
                          + b_padded * a_pad * 2         # out (bf16 write)
                          + w1p.size * 2 + w2p.size * 2  # weights (bf16)
                          + b1p.size * 4 + b2p.size * 4)

        out = pl.pallas_call(
            kernel,
            out_shape=jax.ShapeDtypeStruct((b_padded, a_pad), jnp.bfloat16),
            grid=(n_steps,),
            in_specs=[
                pl.BlockSpec((tile, d_in), lambda i: (i, 0)),
                # Weights / biases pinned: same block every step -> stay VMEM-resident.
                pl.BlockSpec((d_in, hidden), lambda i: (0, 0)),
                pl.BlockSpec((1, hidden), lambda i: (0, 0)),
                pl.BlockSpec((hidden, a_pad), lambda i: (0, 0)),
                pl.BlockSpec((1, a_pad), lambda i: (0, 0)),
            ],
            out_specs=pl.BlockSpec((tile, a_pad), lambda i: (i, 0)),
            compiler_params=pltpu.CompilerParams(
                dimension_semantics=("parallel",),   # shard batch over 2 TCs (v7x)
                vmem_limit_bytes=32 << 20,           # explicit headroom (v5e default is 16 MiB)
            ),
            cost_estimate=pl.CostEstimate(
                flops=flops, transcendentals=0, bytes_accessed=bytes_accessed),
        )(xp, w1p, b1p, w2p, b2p)
        out = out[:B]

    # Slice off the lane padding and upcast once (tiny (B, A) op).
    return out[:, :num_actions].astype(jnp.float32)


# ----------------------------------------------------------------------------
# Init + references
# ----------------------------------------------------------------------------
def init_params(key, input_shape, num_actions, hidden=256):
    """Mimics nn.Linear's U(-1/sqrt(fan_in), 1/sqrt(fan_in)) init."""
    k1, k2, k3, k4 = jax.random.split(key, 4)
    bound1 = 1.0 / jnp.sqrt(jnp.float32(input_shape))
    bound2 = 1.0 / jnp.sqrt(jnp.float32(hidden))
    w1 = jax.random.uniform(k1, (input_shape, hidden), jnp.float32, -bound1, bound1)
    b1 = jax.random.uniform(k2, (1, hidden), jnp.float32, -bound1, bound1)
    w2 = jax.random.uniform(k3, (hidden, num_actions), jnp.float32, -bound2, bound2)
    b2 = jax.random.uniform(k4, (1, num_actions), jnp.float32, -bound2, bound2)
    return w1, b1, w2, b2


def reference_forward_f32(x, w1, b1, w2, b2):
    h = jnp.maximum(x @ w1 + b1, 0.0)
    return h @ w2 + b2


def reference_forward_kernel_numerics(x, w1, b1, w2, b2, *, bf16_epilogue):
    """Matches the kernel: bf16 MXU operands, f32 accumulation, bf16 store."""
    hi = jax.lax.Precision.HIGHEST
    f32 = jnp.float32
    xb = x.astype(jnp.bfloat16).astype(f32)
    w1b = w1.astype(jnp.bfloat16).astype(f32)
    h = jnp.dot(xb, w1b, precision=hi)
    if bf16_epilogue:
        h = jnp.maximum(h.astype(jnp.bfloat16) + b1.astype(jnp.bfloat16),
                        0.0).astype(f32)
    else:
        h = jnp.maximum(h + b1, 0.0)
    hb = h.astype(jnp.bfloat16).astype(f32)
    w2b = w2.astype(jnp.bfloat16).astype(f32)
    q = jnp.dot(hb, w2b, precision=hi) + b2
    return q.astype(jnp.bfloat16).astype(f32)


if __name__ == "__main__":
    key = jax.random.PRNGKey(0)
    k_x, k_p, k_x2 = jax.random.split(key, 3)

    batch = 8
    input_shape = 32    # observation dim
    num_actions = 4

    x = jax.random.normal(k_x, (batch, input_shape), jnp.float32)
    w1, b1, w2, b2 = init_params(k_p, input_shape, num_actions)

    # One-time weight prep (hoisted out of the per-call path).
    prepared = prepare_params(w1, b1, w2, b2)
    fwd = jax.jit(lambda xx: q_network_forward(xx, prepared))

    # --- Small (acting) path: single VMEM block, no grid. ---
    out = jax.block_until_ready(fwd(x))
    assert out.shape == (batch, num_actions)
    ref_k = reference_forward_kernel_numerics(x, w1, b1, w2, b2,
                                              bf16_epilogue=_BF16_EPILOGUE)
    ref_f32 = reference_forward_f32(x, w1, b1, w2, b2)
    assert jnp.allclose(out, ref_k, atol=2e-3, rtol=2e-3)
    assert jnp.allclose(out, ref_f32, atol=5e-2, rtol=5e-2)

    # --- Large (replay/training) path: batch-tiled grid, weights pinned. ---
    # Odd batch size exercises the sublane-rounded padding path.
    big_batch = 1000
    xl = jax.random.normal(k_x2, (big_batch, input_shape), jnp.float32)
    out_l = jax.block_until_ready(fwd(xl))
    assert out_l.shape == (big_batch, num_actions)
    ref_l = reference_forward_kernel_numerics(xl, w1, b1, w2, b2,
                                              bf16_epilogue=_BF16_EPILOGUE)
    assert jnp.allclose(out_l, ref_l, atol=2e-3, rtol=2e-3)
    assert jnp.allclose(out_l, reference_forward_f32(xl, w1, b1, w2, b2),
                        atol=5e-2, rtol=5e-2)

    print("KERNEL_OK")
</pallas_src>

<mosaic_0001>
module attributes {stable_mosaic.version = 11 : i64} {
  func.func @mlp_kernel(%arg0: memref<8x32xf32, #tpu.memory_space<vmem>>, %arg1: memref<32x256xbf16, #tpu.memory_space<vmem>>, %arg2: memref<1x256xf32, #tpu.memory_space<vmem>>, %arg3: memref<256x128xbf16, #tpu.memory_space<vmem>>, %arg4: memref<1x128xf32, #tpu.memory_space<vmem>>, %arg5: memref<8x128xbf16, #tpu.memory_space<vmem>>) attributes {dimension_semantics = [], scalar_prefetch = 0 : i64, scratch_operands = 0 : i64, tpu.core_type = #tpu.core_type<tc>} {
    %c0 = arith.constant 0 : index
    %c0_0 = arith.constant 0 : index
    %0 = vector.load %arg0[%c0, %c0_0] : memref<8x32xf32, #tpu.memory_space<vmem>>, vector<8x32xf32>
    %1 = arith.truncf %0 : vector<8x32xf32> to vector<8x32xbf16>
    %c0_1 = arith.constant 0 : index
    %c0_2 = arith.constant 0 : index
    %2 = vector.load %arg1[%c0_1, %c0_2] : memref<32x256xbf16, #tpu.memory_space<vmem>>, vector<32x256xbf16>
    %cst = arith.constant dense<0.000000e+00> : vector<8x256xf32>
    %3 = tpu.matmul %1, %2, %cst {dimension_numbers = #tpu.dot_dimension_numbers<[1], [0], [0], [1], [0, 0, 1, 1], [], []>} : vector<8x32xbf16>, vector<32x256xbf16>, vector<8x256xf32> -> vector<8x256xf32>
    %4 = arith.truncf %3 : vector<8x256xf32> to vector<8x256xbf16>
    %c0_3 = arith.constant 0 : index
    %c0_4 = arith.constant 0 : index
    %5 = vector.load %arg2[%c0_3, %c0_4] : memref<1x256xf32, #tpu.memory_space<vmem>>, vector<1x256xf32>
    %6 = arith.truncf %5 : vector<1x256xf32> to vector<1x256xbf16>
    %7 = vector.broadcast %6 : vector<1x256xbf16> to vector<8x256xbf16>
    %8 = arith.addf %4, %7 : vector<8x256xbf16>
    %cst_5 = arith.constant 0.000000e+00 : bf16
    %9 = vector.broadcast %cst_5 : bf16 to vector<8x256xbf16>
    %10 = arith.maximumf %8, %9 : vector<8x256xbf16>
    %c0_6 = arith.constant 0 : index
    %c0_7 = arith.constant 0 : index
    %11 = vector.load %arg3[%c0_6, %c0_7] : memref<256x128xbf16, #tpu.memory_space<vmem>>, vector<256x128xbf16>
    %cst_8 = arith.constant dense<0.000000e+00> : vector<8x128xf32>
    %12 = tpu.matmul %10, %11, %cst_8 {dimension_numbers = #tpu.dot_dimension_numbers<[1], [0], [0], [1], [0, 0, 1, 1], [], []>} : vector<8x256xbf16>, vector<256x128xbf16>, vector<8x128xf32> -> vector<8x128xf32>
    %c0_9 = arith.constant 0 : index
    %c0_10 = arith.constant 0 : index
    %13 = vector.load %arg4[%c0_9, %c0_10] : memref<1x128xf32, #tpu.memory_space<vmem>>, vector<1x128xf32>
    %14 = vector.broadcast %13 : vector<1x128xf32> to vector<8x128xf32>
    %15 = arith.addf %12, %14 : vector<8x128xf32>
    %16 = arith.truncf %15 : vector<8x128xf32> to vector<8x128xbf16>
    %c0_11 = arith.constant 0 : index
    %c0_12 = arith.constant 0 : index
    %17 = vector.load %arg5[%c0_11, %c0_12] : memref<8x128xbf16, #tpu.memory_space<vmem>>, vector<8x128xbf16>
    tpu.vector_store %arg5[%c0_11, %c0_12], %16 {strides = array<i32>} : memref<8x128xbf16, #tpu.memory_space<vmem>>, vector<8x128xbf16>,
    return
  }
}

</mosaic_0001>

<bundles_post_ra>
// kernel: _lambda_.1
= control target key start
LH: loop header
LB: loop body
LE: loop exit
PB: predicated region body
PF: predicated region fallthrough
CT: control target
= control target key end

     0   :  { %10 = vsyncpa [#allocation3], 0  ;;  %s545_s0 = inlined_call_operand.hbm [shape: f32[8,32], index: 0, kind: input, shape index: {}]   ;;  %s546_s1 = inlined_call_operand.hbm [shape: bf16[32,256], index: 1, kind: input, shape index: {}]   ;;  %s547_s2 = inlined_call_operand.vmem [shape: f32[1,256], index: 2, kind: input, shape index: {}]   ;;  %s548_s3 = inlined_call_operand.hbm [shape: bf16[256,128], index: 3, kind: input, shape index: {}]   ;;  %s549_s4 = inlined_call_operand.vmem [shape: f32[1,128], index: 4, kind: input, shape index: {}]   ;;  %s550_s5 = inlined_call_operand.vmem [shape: bf16[8,128], index: 5, kind: output, shape index: {}]  }
   0x1   :  { %11 = vsyncpa [#allocation5], 0  ;;  %s486_s18 = smov [#allocation4]  }
   0x2   :  { %s27_s19 = sshll.u32 %s486_s18, 4  ;;  %s28_s19 = int_to_ptr.vmem [resolvable:$true] %s27_s19 }
   0x3   :  { %s430_s20 = scalar_lea.vmem %s28_s19, 512  ;;  %p435_p1 = scmp.lt.s32.totalorder %s28_s19, %s28_s19 }
   0x4   :  { %p431_p0 = scmp.ne.s32.totalorder %s28_s19, %s430_s20  ;;  %p436_p2 = scmp.lt.s32.totalorder %s430_s20, %s430_s20 }
   0x6   :  { %p437_p3 = por %p436_p2, %p435_p1 }
   0x8   :  { %p438_p4 = pnand %p437_p3, %p431_p0 }
   0xa   :  { %441 = shalt.err (!%p438_p4)
}
   0xb   :  { %s487_s21 = smov 128   ;;  %s488_s22 = smov 8  }
   0xc   :  { %33 = dma.hbm_to_vmem [thread:$0]  %s546_s1, 512, %s28_s19, [#allocation5], %s487_s21, %s487_s21, %s488_s22  }
   0xd   :  { %s489_s25 = smov [#allocation2]   ;;  %s490_s27 = smov [#allocation6]  }
   0xe   :  { %s18_s26 = sshll.u32 %s489_s25, 4  ;;  %s41_s28 = sshll.u32 %s490_s27, 4  ;;  %s19_s26 = int_to_ptr.vmem [resolvable:$true] %s18_s26  ;;  %s42_s28 = int_to_ptr.vmem [resolvable:$true] %s41_s28 }
   0xf   :  { %s450_s29 = scalar_lea.vmem %s19_s26, 128  ;;  %p455_p6 = scmp.lt.s32.totalorder %s19_s26, %s19_s26 }
  0x10   :  { %p451_p5 = scmp.ne.s32.totalorder %s19_s26, %s450_s29  ;;  %p456_p7 = scmp.lt.s32.totalorder %s450_s29, %s450_s29 }
  0x12   :  { %p457_p8 = por %p456_p7, %p455_p6 }
  0x14   :  { %p458_p9 = pnand %p457_p8, %p451_p5 }
  0x16   :  { %461 = shalt.err (!%p458_p9)
}
  0x17   :  { %21 = dma.hbm_to_vmem [thread:$0]  %s545_s0, 128, %s19_s26, [#allocation3]  }
  0x18   :  { %s470_s7 = scalar_lea.vmem %s42_s28, 2048  ;;  %p475_p11 = scmp.lt.s32.totalorder %s42_s28, %s42_s28 }
  0x19   :  { %p471_p10 = scmp.ne.s32.totalorder %s42_s28, %s470_s7  ;;  %p476_p12 = scmp.lt.s32.totalorder %s470_s7, %s470_s7 }
  0x1b   :  { %p477_p13 = por %p476_p12, %p475_p11 }
  0x1d   :  { %p478_p0 = pnand %p477_p13, %p471_p10 }
  0x1f   :  { %481 = shalt.err (!%p478_p0)
}
  0x20   :  { %s491_s1 = smov 64   ;;  %s492_s8 = smov 4  }
  0x21   :  { %47 = dma.hbm_to_vmem [thread:$0]  %s548_s3, 2048, %s42_s28, [#allocation5], %s491_s1, %s491_s1, %s492_s8  }
  0x22   :  { %482 = dma.done.wait [#allocation3], 128  }
  0x23   :  { %483 = vsyncadd [#allocation3], 4294967168 }
  0x24   :  { %484 = dma.done.wait [#allocation5], 2560  }
  0x25   :  { %485 = vsyncadd [#allocation5], 4294964736  ;;  %v493_v0 = vmov 0   ;;  %v400_v1 = vld [vmem:[#allocation4 + $0x14] ss:$8 sps:$4 sm:$0xff]   ;;  %vm86_vm0 = vcmask 261120   ;;  %v135_v23 = vlaneseq }
  0x26   :  { %122 = vmatprep.mubr.bf16.mxu0 %v493_v0  ;;  %v402_v2 = vld [vmem:[#allocation4 + $0x10] ss:$8 sps:$4 sm:$0xff]   ;;  %102 = vmatprep.subr.bf16.mxu0 %v400_v1  ;;  %v403_v3 = vld [vmem:[#allocation4 + $0x4] ss:$8 sps:$4 sm:$0xff]   ;;  %v405_v4 = vld [vmem:[#allocation4] ss:$8 sps:$4 sm:$0xff]  }
  0x27   :  { %v60_v5 = vld [vmem:[#allocation2] sm:$0xff]  ;;  %103 = vmatpush1.bf16.msra.mxu0 %v402_v2  ;;  %v408_v8 = vld [vmem:[#allocation6 + $0x70] sm:$0xff]   ;;  %v410_v11 = vld [vmem:[#allocation6 + $0x68] sm:$0xff]   ;;  %v136_v24 = vshrl.u32 %v135_v23, 7 }
  0x28   :  { %v406_v6 = vld [vmem:[#allocation6 + $0x78] sm:$0xff]   ;;  %104 = vmatprep.subr.bf16.mxu0 %v403_v3  ;;  %v61_v9 = vpack.c.bf16 %v60_v5, %v60_v5  ;;  %v409_v10 = vld [vmem:[#allocation6 + $0x30] sm:$0xff]   ;;  %v411_v12 = vld [vmem:[#allocation6 + $0x28] sm:$0xff]  }
  0x29   :  { %v407_v7 = vld [vmem:[#allocation6 + $0x38] sm:$0xff]   ;;  %370 = vmatprep.subr.bf16.mxu1 %v406_v6  ;;  %v412_v13 = vld [vmem:[#allocation6 + $0x60] sm:$0xff]   ;;  %v416_v17 = vld [vmem:[#allocation6 + $0x50] sm:$0xff]   ;;  %v137_v25 = vsub.s32 0, %v136_v24  ;;  %v141_v27 = vsub.s32 1, %v136_v24 }
  0x2a   :  { %371 = vmatpush3.bf16.msra.mxu1 %v407_v7  ;;  %v413_v14 = vld [vmem:[#allocation6 + $0x20] sm:$0xff]   ;;  %v414_v15 = vld [vmem:[#allocation6 + $0x58] sm:$0xff]   ;;  %v417_v18 = vld [vmem:[#allocation6 + $0x10] sm:$0xff]  }
  0x2b   :  { %105 = vmatpush1.bf16.msra.mxu0 %v405_v4  ;;  %372 = vmatprep.subr.bf16.mxu1 %v408_v8  ;;  %v415_v16 = vld [vmem:[#allocation6 + $0x18] sm:$0xff]   ;;  %v418_v19 = vld [vmem:[#allocation6 + $0x48] sm:$0xff]   ;;  %v420_v21 = vld [vmem:[#allocation6 + $0x40] sm:$0xff]  }
  0x2c   :  { %v419_v20 = vld [vmem:[#allocation6 + $0x8] sm:$0xff]   ;;  %v421_v22 = vld [vmem:[#allocation6] sm:$0xff]   ;;  %v133_v26 = vld [vmem:[%s547_s2] sm:$0x3] }
  0x2d   :  { %v138_v28 = vrot.slane %v133_v26, %v137_v25  ;;  %v142_v29 = vrot.slane %v133_v26, %v141_v27  ;;  %v353_v47 = vld [vmem:[%s549_s4] ss:$0 sm:$0xff] }
  0x2e   :  { %352 = vmatmul.mubr.msk.bf16.vlgmr.msra.gmra.mxu0 %vm86_vm0, %v61_v9  ;;  %373 = vmatpush3.bf16.msra.mxu1 %v409_v10 }
  0x2f   :  { %374 = vmatprep.subr.bf16.mxu1 %v410_v11  ;;  %v145_v30 = vpack.c.bf16 %v138_v28, %v138_v28  ;;  %v146_v31 = vpack.c.bf16 %v142_v29, %v142_v29 }
  0x31   :  { %v148_v32 = vpack.i.b16 %v145_v30, %v145_v30  ;;  %v155_v33 = vpack.i.b16 %v146_v31, %v146_v31 }
  0x32   :  { %375 = vmatpush3.bf16.msra.mxu1 %v411_v12 }
  0x33   :  { %376 = vmatprep.subr.bf16.mxu1 %v412_v13  ;;  %v153_v35 = vrot.slane %v148_v32, %v137_v25  ;;  %v160_v37 = vrot.slane %v155_v33, %v137_v25 }
  0x36   :  { %377 = vmatpush3.bf16.msra.mxu1 %v413_v14 }
  0x37   :  { %378 = vmatprep.subr.bf16.mxu1 %v414_v15 }
  0x3a   :  { %379 = vmatpush3.bf16.msra.mxu1 %v415_v16 }
  0x3b   :  { %380 = vmatprep.subr.bf16.mxu1 %v416_v17 }
  0x3e   :  { %381 = vmatpush3.bf16.msra.mxu1 %v417_v18 }
  0x3f   :  { %382 = vmatprep.subr.bf16.mxu1 %v418_v19 }
  0x42   :  { %383 = vmatpush3.bf16.msra.mxu1 %v419_v20 }
  0x43   :  { %384 = vmatprep.subr.bf16.mxu1 %v420_v21 }
  0x46   :  { %385 = vmatpush3.bf16.msra.mxu1 %v421_v22 }
  0xee   :  { %v124_v34 = vpop.f32.mrf.mxu0 }
  0xef   :  { %v131_v36 = vpack.c.bf16 %v124_v34, %v124_v34 }
  0xf0   :  { %v126_v38 = vpop.f32.mrf.mxu0 }
  0xf1   :  { %v132_v39 = vpack.c.bf16 %v126_v38, %v126_v38  ;;  %v161_v40 = vadd.bf16 %v153_v35, %v131_v36 }
  0xf2   :  { %v128_v41 = vpop.f32.mrf.mxu0 }
  0xf3   :  { %v162_v42 = vadd.bf16 %v160_v37, %v132_v39  ;;  %v163_v45 = vmax.bf16 %v493_v0, %v161_v40 }
  0xf4   :  { %v129_v43 = vpop.f32.mrf.mxu0 }
  0xf5   :  { %v164_v44 = vmax.bf16 %v493_v0, %v162_v42 }
  0xf7   :  { %332 = vmatprep.mubr.bf16.mxu1 %v164_v44 }
  0xf8   :  { %333 = vmatmul.mubr.bf16.vlgmr.msra.gmra.mxu1 %v163_v45 }
 0x1b8   :  { %v386_v46 = vpop.f32.mrf.mxu1 }
 0x1ba   :  { %v387_v48 = vpop.f32.mrf.mxu1 }
 0x1bb   :  { %v388_v49 = vadd.f32 %v387_v48, %v386_v46 }
 0x1bc   :  { %v389_v50 = vpop.f32.mrf.mxu1 }
 0x1bd   :  { %v335_v51 = vadd.f32 %v388_v49, %v353_v47 }
 0x1be   :  { %v390_v52 = vpop.f32.mrf.mxu1 }
 0x1bf   :  { %v340_v53 = vpack.c.bf16 %v335_v51, %v335_v51 }
 0x1c1   :  { %341 = vst [vmem:[%s550_s5] sm:$0xf] %v340_v53 }
 0x1c2   :  { %346 = vsyncpa [#allocation3], 1 }
 0x1c3   :  { %347 = vsyncpa [#allocation5], 1 }

</bundles_post_ra>
